<compile_context>
chip_gen: v7x
topology: tpu7x:2x2x1
jax: 0.10.0
libtpu: 0.0.40
codegen_flags: <defaults>
</compile_context>

<pallas_src>
import functools

import jax
import jax.numpy as jnp
from jax.experimental import pallas as pl
from jax.experimental.pallas import tpu as pltpu


# ----------------------------------------------------------------------------
# Pallas kernel: full StoSelfAttention forward for one batch element.
# ----------------------------------------------------------------------------
def _sto_attn_kernel(x_ref, mask_r_ref, mask_c_ref, g_ref,
                     wqkv_ref, bqkv_ref, wo_ref, bo_ref, gamma_ref, beta_ref,
                     o_ref, *, n_heads, head_dim, ln_eps):
    x = x_ref[...]                                            # (S, H) f32
    S, H = x.shape

    # Fused Q/K/V projection: one MXU pass with 3H output lanes.
    # 1/tau2 is already folded into the Q columns of wqkv/bqkv (wrapper).
    qkv = jnp.dot(x, wqkv_ref[...],
                  preferred_element_type=jnp.float32) + bqkv_ref[...]   # (S, 3H)

    # mask_1 * mask_2  ==  outer product of the (S,) mask with itself.
    mm = mask_r_ref[...] * mask_c_ref[...]                    # (S,1)*(1,S) -> (S,S)

    wo = wo_ref[...]                                          # (H, H)
    g = g_ref[...]                                            # (nH, S, S), pre-scaled 1/tau2

    # Per-head attention fused with the output projection:
    #   y = sum_h (attn_h @ V_h) @ Wo[h*hd:(h+1)*hd, :]
    # which is identical to concat_h(attn_h @ V_h) @ Wo but without the concat.
    y = jnp.zeros((S, H), dtype=jnp.float32)
    for h in range(n_heads):                                  # static unroll (n_heads small)
        lo = h * head_dim
        hi = lo + head_dim
        q_h = qkv[:, lo:hi]                                   # (S, hd), carries 1/tau2
        k_h = qkv[:, H + lo:H + hi]                           # (S, hd)
        v_h = qkv[:, 2 * H + lo:2 * H + hi]                   # (S, hd)

        # interact/tau2 + gumbel/tau2  (contract on head_dim, no transpose)
        logits = jax.lax.dot_general(
            q_h, k_h, dimension_numbers=(((1,), (1,)), ((), ())),
            preferred_element_type=jnp.float32) + g[h]        # (S, S)
        logits = logits - jnp.max(logits, axis=-1, keepdims=True)
        e = jnp.exp(logits)
        attn = e * pl.reciprocal(jnp.sum(e, axis=-1, keepdims=True), approx=False)

        # attn_weights = sto_attn_weights * (mask_1 * mask_2)
        # TODO(synk): dropout_attn / dropout_h are identity (eval-mode semantics).
        attn = attn * mm

        ctx_h = jnp.dot(attn, v_h, preferred_element_type=jnp.float32)   # (S, hd)
        y = y + jnp.dot(ctx_h, wo[lo:hi, :],
                        preferred_element_type=jnp.float32)              # (S, H)

    # Output bias, residual add, LayerNorm over the hidden dim.
    z = y + bo_ref[...] + x
    mu = jnp.mean(z, axis=-1, keepdims=True)
    var = jnp.mean((z - mu) ** 2, axis=-1, keepdims=True)
    o_ref[...] = ((z - mu) * jax.lax.rsqrt(var + ln_eps)) * gamma_ref[...] + beta_ref[...]


# ----------------------------------------------------------------------------
# Wrapper
# ----------------------------------------------------------------------------
def sto_self_attention(x, input_mask, gumbel, params, *, n_heads, tau2):
    """x: (B,S,H) f32; input_mask: (B,S) f32; gumbel: (B,nH,S,S) f32."""
    B, S, H = x.shape
    head_dim = H // n_heads
    wq, bq, wk, bk, wv, bv, wo, bo, gamma, beta = params

    inv_tau2 = 1.0 / float(tau2)
    # Constant-fold 1/tau2: scale the Q projection and the gumbel noise here so
    # the kernel never touches tau2 (no per-(S,S) VALU scaling in the kernel).
    wqkv = jnp.concatenate([wq * inv_tau2, wk, wv], axis=1)               # (H, 3H)
    bqkv = jnp.concatenate([bq * inv_tau2, bk, bv]).reshape(1, 3 * H)     # (1, 3H)
    g_scaled = (gumbel * inv_tau2).astype(jnp.float32)

    mask_r = input_mask.reshape(B, S, 1).astype(jnp.float32)
    mask_c = input_mask.reshape(B, 1, S).astype(jnp.float32)
    bo2 = bo.reshape(1, H)
    gamma2, beta2 = gamma.reshape(1, H), beta.reshape(1, H)

    kernel = functools.partial(_sto_attn_kernel, n_heads=n_heads,
                               head_dim=head_dim, ln_eps=1e-5)

    return pl.pallas_call(
        kernel,
        out_shape=jax.ShapeDtypeStruct((B, S, H), jnp.float32),
        grid=(B,),
        in_specs=[
            pl.BlockSpec((None, S, H), lambda b: (b, 0, 0)),              # x
            pl.BlockSpec((None, S, 1), lambda b: (b, 0, 0)),              # mask rows
            pl.BlockSpec((None, 1, S), lambda b: (b, 0, 0)),              # mask cols
            pl.BlockSpec((None, n_heads, S, S), lambda b: (b, 0, 0, 0)),  # gumbel / tau2
            pl.BlockSpec((H, 3 * H), lambda b: (0, 0)),                   # Wqkv (fused)
            pl.BlockSpec((1, 3 * H), lambda b: (0, 0)),                   # bqkv (fused)
            pl.BlockSpec((H, H), lambda b: (0, 0)),                       # Wo
            pl.BlockSpec((1, H), lambda b: (0, 0)),                       # bo
            pl.BlockSpec((1, H), lambda b: (0, 0)),                       # gamma
            pl.BlockSpec((1, H), lambda b: (0, 0)),                       # beta
        ],
        out_specs=pl.BlockSpec((None, S, H), lambda b: (b, 0, 0)),
        compiler_params=pltpu.CompilerParams(dimension_semantics=("parallel",)),
    )(x, mask_r, mask_c, g_scaled, wqkv, bqkv, wo, bo2, gamma2, beta2)


# ----------------------------------------------------------------------------
# Pure-JAX reference (same math, same gumbel noise) for correctness check.
# ----------------------------------------------------------------------------
def reference(x, input_mask, gumbel, params, *, n_heads, tau2):
    B, S, H = x.shape
    hd = H // n_heads
    wq, bq, wk, bk, wv, bv, wo, bo, gamma, beta = params
    q = (x @ wq + bq).reshape(B, S, n_heads, hd).transpose(0, 2, 1, 3)
    k = (x @ wk + bk).reshape(B, S, n_heads, hd).transpose(0, 2, 1, 3)
    v = (x @ wv + bv).reshape(B, S, n_heads, hd).transpose(0, 2, 1, 3)
    interact = jnp.einsum('bhqd,bhkd->bhqk', q, k)
    attn = jax.nn.softmax((interact + gumbel) / tau2, axis=-1)
    mm = input_mask[:, None, :, None] * input_mask[:, None, None, :]
    attn = attn * mm
    out = jnp.einsum('bhqk,bhkd->bhqd', attn, v).transpose(0, 2, 1, 3).reshape(B, S, H)
    out = out @ wo + bo
    z = out + x
    mu = jnp.mean(z, axis=-1, keepdims=True)
    var = jnp.mean((z - mu) ** 2, axis=-1, keepdims=True)
    return (z - mu) / jnp.sqrt(var + 1e-5) * gamma + beta


if __name__ == "__main__":
    B, S, H, n_heads, tau2 = 2, 8, 32, 4, 0.7

    key = jax.random.PRNGKey(0)
    ks = jax.random.split(key, 12)

    # Deterministic synthetic parameters (weights stored as (in, out)).
    def w(k):
        return (0.02 * jax.random.normal(k, (H, H))).astype(jnp.float32)

    params = (
        w(ks[0]), 0.01 * jax.random.normal(ks[1], (H,)).astype(jnp.float32),   # Wq, bq
        w(ks[2]), 0.01 * jax.random.normal(ks[3], (H,)).astype(jnp.float32),   # Wk, bk
        w(ks[4]), 0.01 * jax.random.normal(ks[5], (H,)).astype(jnp.float32),   # Wv, bv
        w(ks[6]), 0.01 * jax.random.normal(ks[7], (H,)).astype(jnp.float32),   # Wo, bo
        (1.0 + 0.05 * jax.random.normal(ks[8], (H,))).astype(jnp.float32),     # LN gamma
        (0.05 * jax.random.normal(ks[9], (H,))).astype(jnp.float32),           # LN beta
    )

    x = jax.random.normal(ks[10], (B, S, H), dtype=jnp.float32)
    # Padding-style mask: first batch fully valid, second has last 3 positions masked.
    input_mask = jnp.array(
        [[1.0] * S, [1.0] * (S - 3) + [0.0] * 3], dtype=jnp.float32)
    # Gumbel noise generated once (deterministic) and shared by kernel and reference.
    gumbel = jax.random.gumbel(ks[11], (B, n_heads, S, S), dtype=jnp.float32)

    out = sto_self_attention(x, input_mask, gumbel, params,
                             n_heads=n_heads, tau2=tau2)
    out = jax.block_until_ready(out)

    ref = reference(x, input_mask, gumbel, params, n_heads=n_heads, tau2=tau2)
    assert out.shape == (B, S, H)
    assert jnp.allclose(out, ref, atol=1e-4, rtol=1e-4), \
        f"max abs err {jnp.max(jnp.abs(out - ref))}"

    print("KERNEL_OK")
</pallas_src>

<mosaic_0001>
module attributes {stable_mosaic.version = 11 : i64} {
  func.func @_sto_attn_kernel(%arg0: i32, %arg1: memref<1x8x32xf32, #tpu.memory_space<vmem>>, %arg2: memref<1x8x1xf32, #tpu.memory_space<vmem>>, %arg3: memref<1x1x8xf32, #tpu.memory_space<vmem>>, %arg4: memref<1x4x8x8xf32, #tpu.memory_space<vmem>>, %arg5: memref<32x96xf32, #tpu.memory_space<vmem>>, %arg6: memref<1x96xf32, #tpu.memory_space<vmem>>, %arg7: memref<32x32xf32, #tpu.memory_space<vmem>>, %arg8: memref<1x32xf32, #tpu.memory_space<vmem>>, %arg9: memref<1x32xf32, #tpu.memory_space<vmem>>, %arg10: memref<1x32xf32, #tpu.memory_space<vmem>>, %arg11: memref<1x8x32xf32, #tpu.memory_space<vmem>>) attributes {dimension_semantics = [#tpu.dimension_semantics<parallel>], iteration_bounds = array<i64: 2>, scalar_prefetch = 0 : i64, scratch_operands = 0 : i64, tpu.core_type = #tpu.core_type<tc>, window_params = [{transform_indices = @transform_0, window_bounds = array<i64: 1, 8, 32>}, {transform_indices = @transform_1, window_bounds = array<i64: 1, 8, 1>}, {transform_indices = @transform_2, window_bounds = array<i64: 1, 1, 8>}, {transform_indices = @transform_3, window_bounds = array<i64: 1, 4, 8, 8>}, {pipeline_mode = #tpu.pipeline_mode<synchronous>, transform_indices = @transform_4, window_bounds = array<i64: 32, 96>}, {pipeline_mode = #tpu.pipeline_mode<synchronous>, transform_indices = @transform_5, window_bounds = array<i64: 1, 96>}, {pipeline_mode = #tpu.pipeline_mode<synchronous>, transform_indices = @transform_6, window_bounds = array<i64: 32, 32>}, {pipeline_mode = #tpu.pipeline_mode<synchronous>, transform_indices = @transform_7, window_bounds = array<i64: 1, 32>}, {pipeline_mode = #tpu.pipeline_mode<synchronous>, transform_indices = @transform_8, window_bounds = array<i64: 1, 32>}, {pipeline_mode = #tpu.pipeline_mode<synchronous>, transform_indices = @transform_9, window_bounds = array<i64: 1, 32>}, {transform_indices = @transform_10, window_bounds = array<i64: 1, 8, 32>}]} {
    %c0 = arith.constant 0 : index
    %c0_0 = arith.constant 0 : index
    %c0_1 = arith.constant 0 : index
    %0 = vector.load %arg1[%c0, %c0_0, %c0_1] : memref<1x8x32xf32, #tpu.memory_space<vmem>>, vector<1x8x32xf32>
    %1 = vector.shape_cast %0 : vector<1x8x32xf32> to vector<8x32xf32>
    %c0_2 = arith.constant 0 : index
    %c0_3 = arith.constant 0 : index
    %2 = vector.load %arg5[%c0_2, %c0_3] : memref<32x96xf32, #tpu.memory_space<vmem>>, vector<32x96xf32>
    %cst = arith.constant dense<0.000000e+00> : vector<8x96xf32>
    %3 = tpu.matmul %1, %2, %cst {dimension_numbers = #tpu.dot_dimension_numbers<[1], [0], [0], [1], [0, 0, 1, 1], [], []>} : vector<8x32xf32>, vector<32x96xf32>, vector<8x96xf32> -> vector<8x96xf32>
    %c0_4 = arith.constant 0 : index
    %c0_5 = arith.constant 0 : index
    %4 = vector.load %arg6[%c0_4, %c0_5] : memref<1x96xf32, #tpu.memory_space<vmem>>, vector<1x96xf32>
    %5 = vector.broadcast %4 : vector<1x96xf32> to vector<8x96xf32>
    %6 = arith.addf %3, %5 : vector<8x96xf32>
    %c0_6 = arith.constant 0 : index
    %c0_7 = arith.constant 0 : index
    %c0_8 = arith.constant 0 : index
    %7 = vector.load %arg2[%c0_6, %c0_7, %c0_8] : memref<1x8x1xf32, #tpu.memory_space<vmem>>, vector<1x8x1xf32>
    %8 = vector.shape_cast %7 : vector<1x8x1xf32> to vector<8x1xf32>
    %c0_9 = arith.constant 0 : index
    %c0_10 = arith.constant 0 : index
    %c0_11 = arith.constant 0 : index
    %9 = vector.load %arg3[%c0_9, %c0_10, %c0_11] : memref<1x1x8xf32, #tpu.memory_space<vmem>>, vector<1x1x8xf32>
    %10 = vector.shape_cast %9 : vector<1x1x8xf32> to vector<1x8xf32>
    %11 = vector.broadcast %8 : vector<8x1xf32> to vector<8x8xf32>
    %12 = vector.broadcast %10 : vector<1x8xf32> to vector<8x8xf32>
    %13 = arith.mulf %11, %12 : vector<8x8xf32>
    %c0_12 = arith.constant 0 : index
    %c0_13 = arith.constant 0 : index
    %14 = vector.load %arg7[%c0_12, %c0_13] : memref<32x32xf32, #tpu.memory_space<vmem>>, vector<32x32xf32>
    %c0_14 = arith.constant 0 : index
    %c0_15 = arith.constant 0 : index
    %c0_16 = arith.constant 0 : index
    %c0_17 = arith.constant 0 : index
    %15 = vector.load %arg4[%c0_14, %c0_15, %c0_16, %c0_17] : memref<1x4x8x8xf32, #tpu.memory_space<vmem>>, vector<1x4x8x8xf32>
    %16 = vector.shape_cast %15 : vector<1x4x8x8xf32> to vector<4x8x8xf32>
    %cst_18 = arith.constant 0.000000e+00 : f32
    %17 = vector.broadcast %cst_18 : f32 to vector<8x32xf32>
    %18 = vector.extract_strided_slice %6 {offsets = [0, 0], sizes = [8, 8], strides = [1, 1]} : vector<8x96xf32> to vector<8x8xf32>
    %19 = vector.extract_strided_slice %6 {offsets = [0, 32], sizes = [8, 8], strides = [1, 1]} : vector<8x96xf32> to vector<8x8xf32>
    %20 = vector.extract_strided_slice %6 {offsets = [0, 64], sizes = [8, 8], strides = [1, 1]} : vector<8x96xf32> to vector<8x8xf32>
    %cst_19 = arith.constant dense<0.000000e+00> : vector<8x8xf32>
    %21 = tpu.matmul %18, %19, %cst_19 {dimension_numbers = #tpu.dot_dimension_numbers<[1], [1], [0], [0], [0, 0, 1, 0], [], []>} : vector<8x8xf32>, vector<8x8xf32>, vector<8x8xf32> -> vector<8x8xf32>
    %22 = vector.extract_strided_slice %16 {offsets = [0, 0, 0], sizes = [1, 8, 8], strides = [1, 1, 1]} : vector<4x8x8xf32> to vector<1x8x8xf32>
    %23 = vector.shape_cast %22 : vector<1x8x8xf32> to vector<8x8xf32>
    %24 = arith.addf %21, %23 : vector<8x8xf32>
    %cst_20 = arith.constant dense<0xFF800000> : vector<8xf32>
    %25 = vector.multi_reduction <maximumf>, %24, %cst_20 [1] : vector<8x8xf32> to vector<8xf32>
    %26 = vector.shape_cast %25 : vector<8xf32> to vector<8x1xf32>
    %27 = vector.broadcast %26 : vector<8x1xf32> to vector<8x8xf32>
    %28 = arith.subf %24, %27 : vector<8x8xf32>
    %29 = math.exp %28 : vector<8x8xf32>
    %cst_21 = arith.constant dense<0.000000e+00> : vector<8xf32>
    %30 = vector.multi_reduction <add>, %29, %cst_21 [1] : vector<8x8xf32> to vector<8xf32>
    %31 = vector.shape_cast %30 : vector<8xf32> to vector<8x1xf32>
    %32 = tpu.reciprocal %31 : vector<8x1xf32> -> vector<8x1xf32>
    %33 = vector.broadcast %32 : vector<8x1xf32> to vector<8x8xf32>
    %34 = arith.mulf %29, %33 : vector<8x8xf32>
    %35 = arith.mulf %34, %13 : vector<8x8xf32>
    %cst_22 = arith.constant dense<0.000000e+00> : vector<8x8xf32>
    %36 = tpu.matmul %35, %20, %cst_22 {dimension_numbers = #tpu.dot_dimension_numbers<[1], [0], [0], [1], [0, 0, 1, 1], [], []>} : vector<8x8xf32>, vector<8x8xf32>, vector<8x8xf32> -> vector<8x8xf32>
    %37 = vector.extract_strided_slice %14 {offsets = [0, 0], sizes = [8, 32], strides = [1, 1]} : vector<32x32xf32> to vector<8x32xf32>
    %cst_23 = arith.constant dense<0.000000e+00> : vector<8x32xf32>
    %38 = tpu.matmul %36, %37, %cst_23 {dimension_numbers = #tpu.dot_dimension_numbers<[1], [0], [0], [1], [0, 0, 1, 1], [], []>} : vector<8x8xf32>, vector<8x32xf32>, vector<8x32xf32> -> vector<8x32xf32>
    %39 = arith.addf %17, %38 : vector<8x32xf32>
    %40 = vector.extract_strided_slice %6 {offsets = [0, 8], sizes = [8, 8], strides = [1, 1]} : vector<8x96xf32> to vector<8x8xf32>
    %41 = vector.extract_strided_slice %6 {offsets = [0, 40], sizes = [8, 8], strides = [1, 1]} : vector<8x96xf32> to vector<8x8xf32>
    %42 = vector.extract_strided_slice %6 {offsets = [0, 72], sizes = [8, 8], strides = [1, 1]} : vector<8x96xf32> to vector<8x8xf32>
    %cst_24 = arith.constant dense<0.000000e+00> : vector<8x8xf32>
    %43 = tpu.matmul %40, %41, %cst_24 {dimension_numbers = #tpu.dot_dimension_numbers<[1], [1], [0], [0], [0, 0, 1, 0], [], []>} : vector<8x8xf32>, vector<8x8xf32>, vector<8x8xf32> -> vector<8x8xf32>
    %44 = vector.extract_strided_slice %16 {offsets = [1, 0, 0], sizes = [1, 8, 8], strides = [1, 1, 1]} : vector<4x8x8xf32> to vector<1x8x8xf32>
    %45 = vector.shape_cast %44 : vector<1x8x8xf32> to vector<8x8xf32>
    %46 = arith.addf %43, %45 : vector<8x8xf32>
    %cst_25 = arith.constant dense<0xFF800000> : vector<8xf32>
    %47 = vector.multi_reduction <maximumf>, %46, %cst_25 [1] : vector<8x8xf32> to vector<8xf32>
    %48 = vector.shape_cast %47 : vector<8xf32> to vector<8x1xf32>
    %49 = vector.broadcast %48 : vector<8x1xf32> to vector<8x8xf32>
    %50 = arith.subf %46, %49 : vector<8x8xf32>
    %51 = math.exp %50 : vector<8x8xf32>
    %cst_26 = arith.constant dense<0.000000e+00> : vector<8xf32>
    %52 = vector.multi_reduction <add>, %51, %cst_26 [1] : vector<8x8xf32> to vector<8xf32>
    %53 = vector.shape_cast %52 : vector<8xf32> to vector<8x1xf32>
    %54 = tpu.reciprocal %53 : vector<8x1xf32> -> vector<8x1xf32>
    %55 = vector.broadcast %54 : vector<8x1xf32> to vector<8x8xf32>
    %56 = arith.mulf %51, %55 : vector<8x8xf32>
    %57 = arith.mulf %56, %13 : vector<8x8xf32>
    %cst_27 = arith.constant dense<0.000000e+00> : vector<8x8xf32>
    %58 = tpu.matmul %57, %42, %cst_27 {dimension_numbers = #tpu.dot_dimension_numbers<[1], [0], [0], [1], [0, 0, 1, 1], [], []>} : vector<8x8xf32>, vector<8x8xf32>, vector<8x8xf32> -> vector<8x8xf32>
    %59 = vector.extract_strided_slice %14 {offsets = [8, 0], sizes = [8, 32], strides = [1, 1]} : vector<32x32xf32> to vector<8x32xf32>
    %cst_28 = arith.constant dense<0.000000e+00> : vector<8x32xf32>
    %60 = tpu.matmul %58, %59, %cst_28 {dimension_numbers = #tpu.dot_dimension_numbers<[1], [0], [0], [1], [0, 0, 1, 1], [], []>} : vector<8x8xf32>, vector<8x32xf32>, vector<8x32xf32> -> vector<8x32xf32>
    %61 = arith.addf %39, %60 : vector<8x32xf32>
    %62 = vector.extract_strided_slice %6 {offsets = [0, 16], sizes = [8, 8], strides = [1, 1]} : vector<8x96xf32> to vector<8x8xf32>
    %63 = vector.extract_strided_slice %6 {offsets = [0, 48], sizes = [8, 8], strides = [1, 1]} : vector<8x96xf32> to vector<8x8xf32>
    %64 = vector.extract_strided_slice %6 {offsets = [0, 80], sizes = [8, 8], strides = [1, 1]} : vector<8x96xf32> to vector<8x8xf32>
    %cst_29 = arith.constant dense<0.000000e+00> : vector<8x8xf32>
    %65 = tpu.matmul %62, %63, %cst_29 {dimension_numbers = #tpu.dot_dimension_numbers<[1], [1], [0], [0], [0, 0, 1, 0], [], []>} : vector<8x8xf32>, vector<8x8xf32>, vector<8x8xf32> -> vector<8x8xf32>
    %66 = vector.extract_strided_slice %16 {offsets = [2, 0, 0], sizes = [1, 8, 8], strides = [1, 1, 1]} : vector<4x8x8xf32> to vector<1x8x8xf32>
    %67 = vector.shape_cast %66 : vector<1x8x8xf32> to vector<8x8xf32>
    %68 = arith.addf %65, %67 : vector<8x8xf32>
    %cst_30 = arith.constant dense<0xFF800000> : vector<8xf32>
    %69 = vector.multi_reduction <maximumf>, %68, %cst_30 [1] : vector<8x8xf32> to vector<8xf32>
    %70 = vector.shape_cast %69 : vector<8xf32> to vector<8x1xf32>
    %71 = vector.broadcast %70 : vector<8x1xf32> to vector<8x8xf32>
    %72 = arith.subf %68, %71 : vector<8x8xf32>
    %73 = math.exp %72 : vector<8x8xf32>
    %cst_31 = arith.constant dense<0.000000e+00> : vector<8xf32>
    %74 = vector.multi_reduction <add>, %73, %cst_31 [1] : vector<8x8xf32> to vector<8xf32>
    %75 = vector.shape_cast %74 : vector<8xf32> to vector<8x1xf32>
    %76 = tpu.reciprocal %75 : vector<8x1xf32> -> vector<8x1xf32>
    %77 = vector.broadcast %76 : vector<8x1xf32> to vector<8x8xf32>
    %78 = arith.mulf %73, %77 : vector<8x8xf32>
    %79 = arith.mulf %78, %13 : vector<8x8xf32>
    %cst_32 = arith.constant dense<0.000000e+00> : vector<8x8xf32>
    %80 = tpu.matmul %79, %64, %cst_32 {dimension_numbers = #tpu.dot_dimension_numbers<[1], [0], [0], [1], [0, 0, 1, 1], [], []>} : vector<8x8xf32>, vector<8x8xf32>, vector<8x8xf32> -> vector<8x8xf32>
    %81 = vector.extract_strided_slice %14 {offsets = [16, 0], sizes = [8, 32], strides = [1, 1]} : vector<32x32xf32> to vector<8x32xf32>
    %cst_33 = arith.constant dense<0.000000e+00> : vector<8x32xf32>
    %82 = tpu.matmul %80, %81, %cst_33 {dimension_numbers = #tpu.dot_dimension_numbers<[1], [0], [0], [1], [0, 0, 1, 1], [], []>} : vector<8x8xf32>, vector<8x32xf32>, vector<8x32xf32> -> vector<8x32xf32>
    %83 = arith.addf %61, %82 : vector<8x32xf32>
    %84 = vector.extract_strided_slice %6 {offsets = [0, 24], sizes = [8, 8], strides = [1, 1]} : vector<8x96xf32> to vector<8x8xf32>
    %85 = vector.extract_strided_slice %6 {offsets = [0, 56], sizes = [8, 8], strides = [1, 1]} : vector<8x96xf32> to vector<8x8xf32>
    %86 = vector.extract_strided_slice %6 {offsets = [0, 88], sizes = [8, 8], strides = [1, 1]} : vector<8x96xf32> to vector<8x8xf32>
    %cst_34 = arith.constant dense<0.000000e+00> : vector<8x8xf32>
    %87 = tpu.matmul %84, %85, %cst_34 {dimension_numbers = #tpu.dot_dimension_numbers<[1], [1], [0], [0], [0, 0, 1, 0], [], []>} : vector<8x8xf32>, vector<8x8xf32>, vector<8x8xf32> -> vector<8x8xf32>
    %88 = vector.extract_strided_slice %16 {offsets = [3, 0, 0], sizes = [1, 8, 8], strides = [1, 1, 1]} : vector<4x8x8xf32> to vector<1x8x8xf32>
    %89 = vector.shape_cast %88 : vector<1x8x8xf32> to vector<8x8xf32>
    %90 = arith.addf %87, %89 : vector<8x8xf32>
    %cst_35 = arith.constant dense<0xFF800000> : vector<8xf32>
    %91 = vector.multi_reduction <maximumf>, %90, %cst_35 [1] : vector<8x8xf32> to vector<8xf32>
    %92 = vector.shape_cast %91 : vector<8xf32> to vector<8x1xf32>
    %93 = vector.broadcast %92 : vector<8x1xf32> to vector<8x8xf32>
    %94 = arith.subf %90, %93 : vector<8x8xf32>
    %95 = math.exp %94 : vector<8x8xf32>
    %cst_36 = arith.constant dense<0.000000e+00> : vector<8xf32>
    %96 = vector.multi_reduction <add>, %95, %cst_36 [1] : vector<8x8xf32> to vector<8xf32>
    %97 = vector.shape_cast %96 : vector<8xf32> to vector<8x1xf32>
    %98 = tpu.reciprocal %97 : vector<8x1xf32> -> vector<8x1xf32>
    %99 = vector.broadcast %98 : vector<8x1xf32> to vector<8x8xf32>
    %100 = arith.mulf %95, %99 : vector<8x8xf32>
    %101 = arith.mulf %100, %13 : vector<8x8xf32>
    %cst_37 = arith.constant dense<0.000000e+00> : vector<8x8xf32>
    %102 = tpu.matmul %101, %86, %cst_37 {dimension_numbers = #tpu.dot_dimension_numbers<[1], [0], [0], [1], [0, 0, 1, 1], [], []>} : vector<8x8xf32>, vector<8x8xf32>, vector<8x8xf32> -> vector<8x8xf32>
    %103 = vector.extract_strided_slice %14 {offsets = [24, 0], sizes = [8, 32], strides = [1, 1]} : vector<32x32xf32> to vector<8x32xf32>
    %cst_38 = arith.constant dense<0.000000e+00> : vector<8x32xf32>
    %104 = tpu.matmul %102, %103, %cst_38 {dimension_numbers = #tpu.dot_dimension_numbers<[1], [0], [0], [1], [0, 0, 1, 1], [], []>} : vector<8x8xf32>, vector<8x32xf32>, vector<8x32xf32> -> vector<8x32xf32>
    %105 = arith.addf %83, %104 : vector<8x32xf32>
    %c0_39 = arith.constant 0 : index
    %c0_40 = arith.constant 0 : index
    %106 = vector.load %arg8[%c0_39, %c0_40] : memref<1x32xf32, #tpu.memory_space<vmem>>, vector<1x32xf32>
    %107 = vector.broadcast %106 : vector<1x32xf32> to vector<8x32xf32>
    %108 = arith.addf %105, %107 : vector<8x32xf32>
    %109 = arith.addf %108, %1 : vector<8x32xf32>
    %cst_41 = arith.constant dense<0.000000e+00> : vector<8xf32>
    %110 = vector.multi_reduction <add>, %109, %cst_41 [1] : vector<8x32xf32> to vector<8xf32>
    %111 = vector.shape_cast %110 : vector<8xf32> to vector<8x1xf32>
    %cst_42 = arith.constant 3.200000e+01 : f32
    %112 = vector.broadcast %cst_42 : f32 to vector<8x1xf32>
    %113 = arith.divf %111, %112 : vector<8x1xf32>
    %114 = vector.broadcast %113 : vector<8x1xf32> to vector<8x32xf32>
    %115 = arith.subf %109, %114 : vector<8x32xf32>
    %116 = arith.mulf %115, %115 : vector<8x32xf32>
    %cst_43 = arith.constant dense<0.000000e+00> : vector<8xf32>
    %117 = vector.multi_reduction <add>, %116, %cst_43 [1] : vector<8x32xf32> to vector<8xf32>
    %118 = vector.shape_cast %117 : vector<8xf32> to vector<8x1xf32>
    %cst_44 = arith.constant 3.200000e+01 : f32
    %119 = vector.broadcast %cst_44 : f32 to vector<8x1xf32>
    %120 = arith.divf %118, %119 : vector<8x1xf32>
    %121 = vector.broadcast %113 : vector<8x1xf32> to vector<8x32xf32>
    %122 = arith.subf %109, %121 : vector<8x32xf32>
    %cst_45 = arith.constant 9.99999974E-6 : f32
    %123 = vector.broadcast %cst_45 : f32 to vector<8x1xf32>
    %124 = arith.addf %120, %123 : vector<8x1xf32>
    %125 = math.rsqrt %124 : vector<8x1xf32>
    %126 = vector.broadcast %125 : vector<8x1xf32> to vector<8x32xf32>
    %127 = arith.mulf %122, %126 : vector<8x32xf32>
    %c0_46 = arith.constant 0 : index
    %c0_47 = arith.constant 0 : index
    %128 = vector.load %arg9[%c0_46, %c0_47] : memref<1x32xf32, #tpu.memory_space<vmem>>, vector<1x32xf32>
    %129 = vector.broadcast %128 : vector<1x32xf32> to vector<8x32xf32>
    %130 = arith.mulf %127, %129 : vector<8x32xf32>
    %c0_48 = arith.constant 0 : index
    %c0_49 = arith.constant 0 : index
    %131 = vector.load %arg10[%c0_48, %c0_49] : memref<1x32xf32, #tpu.memory_space<vmem>>, vector<1x32xf32>
    %132 = vector.broadcast %131 : vector<1x32xf32> to vector<8x32xf32>
    %133 = arith.addf %130, %132 : vector<8x32xf32>
    %c0_50 = arith.constant 0 : index
    %c0_51 = arith.constant 0 : index
    %c0_52 = arith.constant 0 : index
    %134 = vector.load %arg11[%c0_50, %c0_51, %c0_52] : memref<1x8x32xf32, #tpu.memory_space<vmem>>, vector<1x8x32xf32>
    %135 = vector.shape_cast %134 : vector<1x8x32xf32> to vector<8x32xf32>
    %136 = vector.shape_cast %133 : vector<8x32xf32> to vector<1x8x32xf32>
    tpu.vector_store %arg11[%c0_50, %c0_51, %c0_52], %136 {strides = array<i32>} : memref<1x8x32xf32, #tpu.memory_space<vmem>>, vector<1x8x32xf32>,
    return
  }
  func.func @transform_0(%arg0: i32) -> (i32, i32, i32) {
    %c0_i32 = arith.constant 0 : i32
    %c0_i32_0 = arith.constant 0 : i32
    %c0_i32_1 = arith.constant 0 : i32
    return %arg0, %c0_i32, %c0_i32_0 : i32, i32, i32
  }
  func.func @transform_1(%arg0: i32) -> (i32, i32, i32) {
    %c0_i32 = arith.constant 0 : i32
    %c0_i32_0 = arith.constant 0 : i32
    %c0_i32_1 = arith.constant 0 : i32
    return %arg0, %c0_i32, %c0_i32_0 : i32, i32, i32
  }
  func.func @transform_2(%arg0: i32) -> (i32, i32, i32) {
    %c0_i32 = arith.constant 0 : i32
    %c0_i32_0 = arith.constant 0 : i32
    %c0_i32_1 = arith.constant 0 : i32
    return %arg0, %c0_i32, %c0_i32_0 : i32, i32, i32
  }
  func.func @transform_3(%arg0: i32) -> (i32, i32, i32, i32) {
    %c0_i32 = arith.constant 0 : i32
    %c0_i32_0 = arith.constant 0 : i32
    %c0_i32_1 = arith.constant 0 : i32
    %c0_i32_2 = arith.constant 0 : i32
    return %arg0, %c0_i32, %c0_i32_0, %c0_i32_1 : i32, i32, i32, i32
  }
  func.func @transform_4(%arg0: i32) -> (i32, i32) {
    %c0_i32 = arith.constant 0 : i32
    %c0_i32_0 = arith.constant 0 : i32
    %c0_i32_1 = arith.constant 0 : i32
    return %c0_i32, %c0_i32_0 : i32, i32
  }
  func.func @transform_5(%arg0: i32) -> (i32, i32) {
    %c0_i32 = arith.constant 0 : i32
    %c0_i32_0 = arith.constant 0 : i32
    %c0_i32_1 = arith.constant 0 : i32
    return %c0_i32, %c0_i32_0 : i32, i32
  }
  func.func @transform_6(%arg0: i32) -> (i32, i32) {
    %c0_i32 = arith.constant 0 : i32
    %c0_i32_0 = arith.constant 0 : i32
    %c0_i32_1 = arith.constant 0 : i32
    return %c0_i32, %c0_i32_0 : i32, i32
  }
  func.func @transform_7(%arg0: i32) -> (i32, i32) {
    %c0_i32 = arith.constant 0 : i32
    %c0_i32_0 = arith.constant 0 : i32
    %c0_i32_1 = arith.constant 0 : i32
    return %c0_i32, %c0_i32_0 : i32, i32
  }
  func.func @transform_8(%arg0: i32) -> (i32, i32) {
    %c0_i32 = arith.constant 0 : i32
    %c0_i32_0 = arith.constant 0 : i32
    %c0_i32_1 = arith.constant 0 : i32
    return %c0_i32, %c0_i32_0 : i32, i32
  }
  func.func @transform_9(%arg0: i32) -> (i32, i32) {
    %c0_i32 = arith.constant 0 : i32
    %c0_i32_0 = arith.constant 0 : i32
    %c0_i32_1 = arith.constant 0 : i32
    return %c0_i32, %c0_i32_0 : i32, i32
  }
  func.func @transform_10(%arg0: i32) -> (i32, i32, i32) {
    %c0_i32 = arith.constant 0 : i32
    %c0_i32_0 = arith.constant 0 : i32
    %c0_i32_1 = arith.constant 0 : i32
    return %arg0, %c0_i32, %c0_i32_0 : i32, i32, i32
  }
}

</mosaic_0001>

<bundles_post_ra>
// kernel: tpu_custom_call.1
= control target key start
LH: loop header
LB: loop body
LE: loop exit
PB: predicated region body
PF: predicated region fallthrough
CT: control target
= control target key end

     0   :  { %s2673_s0 = inlined_call_operand.hbm [shape: f32[2,8,32], index: 0, kind: input, shape index: {}]   ;;  %s2674_s1 = inlined_call_operand.vmem [shape: f32[2,8,1], index: 1, kind: input, shape index: {}]   ;;  %s2675_s2 = inlined_call_operand.hbm [shape: f32[2,1,8], index: 2, kind: input, shape index: {}]   ;;  %s2676_s3 = inlined_call_operand.hbm [shape: f32[2,4,8,8], index: 3, kind: input, shape index: {}]   ;;  %s2677_s4 = inlined_call_operand.vmem [shape: f32[32,96], index: 4, kind: input, shape index: {}]   ;;  %s2678_s5 = inlined_call_operand.vmem [shape: f32[1,96], index: 5, kind: input, shape index: {}]   ;;  %s2679_s6 = inlined_call_operand.hbm [shape: f32[32,32], index: 6, kind: input, shape index: {}]   ;;  %s2680_s7 = inlined_call_operand.vmem [shape: f32[1,32], index: 7, kind: input, shape index: {}]   ;;  %s2681_s8 = inlined_call_operand.vmem [shape: f32[1,32], index: 8, kind: input, shape index: {}]   ;;  %s2682_s9 = inlined_call_operand.vmem [shape: f32[1,32], index: 9, kind: input, shape index: {}]   ;;  %s2683_s10 = inlined_call_operand.hbm [shape: f32[2,8,32], index: 10, kind: output, shape index: {}]  }
   0x1   :  { %2701 = sst [smem:[#allocation21_spill]] %s2675_s2 }
   0x2   :  { %2702 = sst [smem:[#allocation22_spill]] %s2681_s8 }
   0x3   :  { %2703 = sst [smem:[#allocation23_spill]] %s2682_s9 }
   0x4   :  { %2704 = sst [smem:[#allocation24_spill]] %s2683_s10 }
   0x5   :  { %15 = vsyncpa [#allocation3], 0 }
   0x6   :  { %17 = vsyncpa [#allocation3 + $0x1], 0 }
   0x7   :  { %18 = vsyncpa [#allocation6], 0 }
   0x8   :  { %20 = vsyncpa [#allocation6 + $0x1], 0 }
   0x9   :  { %21 = vsyncpa [#allocation9], 0 }
   0xa   :  { %22 = vsyncpa [#allocation4], 0 }
   0xb   :  { %24 = vsyncpa [#allocation4 + $0x1], 0  ;;  %s2253_s13 = smov 0   ;;  %s2255_s14 = smov 0  }
   0xc   :  { %s2257_s15 = smov 0   ;;  %s2259_s16 = smov 0  }
   0xd LB: > { %2705 = sst [smem:[#allocation15_spill]] %s2162_s13  ;;  %s2274_s17 = sadd.s32 1, %s2174_s16   ;;  %s2174_s16 = sphi %s2259_s16, %s2736_s16   ;;  %s2170_s15 = sphi %s2257_s15, %s2738_s15   ;;  %s2166_s14 = sphi %s2255_s14, %s2740_s14   ;;  %s2162_s13 = sphi %s2253_s13, %s2739_s13  }
   0xe   : > { %2706 = sst [smem:[#allocation16_spill]] %s2170_s15  ;;  %s37_s18 = sadd.s32 1, %s2170_s15 }
   0xf   : > { %2707 = sst [smem:[#allocation17_spill]] %s2274_s17  ;;  %s34_s19 = ssub.s32 %s2174_s16, %s2274_s17 }
  0x10   : > { %p2684_p0 = scmp.ne.s32.totalorder %s2170_s15, %s2166_s14  ;;  %p35_p1 = scmp.eq.s32.totalorder %s34_s19, 0 }
  0x11   : > { %p45_p2 = scmp.eq.s32.totalorder %s2174_s16, 0  ;;  %p1910_p4 = scmp.lt.s32.totalorder %s2174_s16, 2 }
  0x12   : > { %s2285_s20 = scalar_select %p35_p1, %s2170_s15, %s37_s18  }
  0x13   : > { %p46_p5 = por %p45_p2, %p2684_p0  ;;  %s2291_s21 = sand.u32 1, %s2170_s15  }
  0x14   : > { %2708 = sst [smem:[#allocation18_spill]] %s2285_s20  ;;  %s357_s22 = sand.u32 1, %s2174_s16  }
  0x15   : > { %p2294_p6 = pnand %p1910_p4, %p46_p5  ;;  %s1736_s24 = sshll.u32 %s2174_s16, 4 }
  0x16   : > { %s360_s25 = scalar_lea.vmem [#allocation5], %s2291_s21  ;;  %s2710_s2 = sld [smem:[#allocation21_spill]] }
  0x17   : > { %s2709_s23 = scalar_select %p2294_p6, 1, 0 }
  0x18   : > { %s367_s26 = sshll.u32 %s360_s25, 4  ;;  %s2308_s11 = scalar_lea.sflag [#allocation6], %s357_s22  ;;  %s2305_s26 = int_to_ptr.vmem [resolvable:$true] %s367_s26 }
  0x19   : > { %p2314_p8 = pneg %p2294_p6 }
  0x1b   : > { %s2711_s18 = scalar_select %p2314_p8, 1, 0 }
  0x1c   : > { %s2303_s29 = scalar_lea.hbm %s2710_s2, %s1736_s24  ;;  %s1987_s25 = scalar_lea.hbm %s2710_s2, 32 }
  0x1d   : > { %s1982_s12 = scalar_lea.hbm %s2303_s29, 16  ;;  %p1988_p11 = scmp.lt.u32.totalorder %s2303_s29, %s2710_s2 }
  0x1e   : > { %p1983_p7 = scmp.ne.s32.totalorder %s2303_s29, %s1982_s12  ;;  %p1989_p12 = scmp.lt.u32.totalorder %s1987_s25, %s1982_s12 }
  0x1f   : > { %p1991_p1 = scmp.lt.u32.totalorder %s1982_s12, %s2303_s29 }
  0x20   : > { %p1985_p9 = pnand %p2314_p8, %p1983_p7  ;;  %p1990_p13 = por %p1989_p12, %p1988_p11 }
  0x22   : > { %p1986_p10 = pneg %p1985_p9  ;;  %p1992_p2 = por %p1991_p1, %p1990_p13 }
  0x24   : > { %p1993_p4 = pnand %p1992_p2, %p1986_p10 }
  0x26   : > { %1996 = shalt.err (!%p1993_p4)
}
  0x27   : > { %s1997_s22 = scalar_lea.vmem %s2305_s26, 16  ;;  %s2176_s19 = smov [#allocation5]  }
  0x28   : > { %p1998_p5 = scmp.ne.s32.totalorder %s2305_s26, %s1997_s22  ;;  %s2002_s24 = sshll.u32 %s2176_s19, 4  ;;  %s2003_s24 = int_to_ptr.vmem [resolvable:$false] %s2002_s24 }
  0x29   : > { %s2004_s27 = scalar_lea.vmem %s2003_s24, 32  ;;  %p2005_p3 = scmp.lt.s32.totalorder %s2305_s26, %s2003_s24 }
  0x2a   : > { %p2000_p7 = pnand %p1998_p5, %p2314_p8  ;;  %p2006_p0 = scmp.lt.s32.totalorder %s2004_s27, %s1997_s22 }
  0x2c   : > { %p2001_p9 = pneg %p2000_p7  ;;  %p2007_p11 = por %p2006_p0, %p2005_p3 }
  0x2e   : > { %p2008_p12 = pnand %p2007_p11, %p2001_p9 }
  0x30   : > { %2011 = shalt.err (!%p2008_p12)
}
  0x31   : > { %1901 = dma.hbm_to_vmem [thread:$0]  (!%p2294_p6), %s2303_s29, 16, %s2305_s26, %s2308_s11  }
  0x32   : > { %s2339_s12 = sadd.s32 4294967295, %s2174_s16   ;;  %s1730_s25 = sadd.s32 4294967294, %s2174_s16  }
  0x33   : > { %p50_p0 = scmp.ne.s32.totalorder %s2166_s14, %s2162_s13  ;;  %p2691_p3 = scmp.eq.s32.totalorder %s2339_s12, 0 }
  0x34   : > { %p278_p10 = scmp.eq.s32.totalorder %s2339_s12, 1  ;;  %p284_p13 = scmp.eq.s32.totalorder %s1730_s25, 1 }
  0x35   : > { %p2348_p1 = por %p2691_p3, %p50_p0  ;;  %p1731_p2 = scmp.ge.s32.totalorder %s2174_s16, 1 }
  0x36   : > { %p2713_p4 = scmp.ne.s32.totalorder %s2170_s15, %s2166_s14  ;;  %p2360_p7 = por %p284_p13, %p50_p0 }
  0x37   : > { %s2712_s28 = scalar_select %p2348_p1, 1, 0 }
  0x38   : > { %p2356_p5 = por %p278_p10, %p2713_p4  ;;  %p291_p9 = scmp.lt.s32.totalorder %s2174_s16, 3 }
  0x39   : > { %s2716_s29 = scalar_select %p2360_p7, 1, 0 }
  0x3a   : > { %s2714_s26 = scalar_select %p2356_p5, 1, 0 }
  0x3b   : > { %2717 = sst [smem:[#allocation20_spill]] %s2716_s29  ;;  %p2365_p11 = pnand %p1731_p2, %p291_p9 }
  0x3c   : > { %2715 = sst [smem:[#allocation19_spill]] %s2714_s26  ;;  %s2177_s19 = smov [#allocation8]  }
  0x3d   : > { %s2718_s22 = scalar_select %p2365_p11, 1, 0 }
  0x3e   : > { %s309_s24 = sshll.u32 %s2177_s19, 4  ;;  %p1891_p12 = pneg %p2365_p11  ;;  %s2369_s24 = int_to_ptr.vmem [resolvable:$true] %s309_s24 }
  0x3f   : > { %s1734_s27 = sshll.u32 %s2291_s21, 3  ;;  %s1735_s25 = sshll.u32 %s2174_s16, 7 }
  0x40   : > { %p2377_p10 = pnand %p1891_p12, %p2691_p3  ;;  %s2384_s15 = scalar_lea.hbm %s2673_s0, %s1735_s25 }
  0x41   : > { %s336_s17 = scalar_lea.vmem [#allocation2], %s1734_s27  ;;  %s2012_s10 = scalar_lea.hbm %s2679_s6, 512 }
  0x42   : > { %s343_s29 = sshll.u32 %s336_s17, 4  ;;  %p2013_p0 = scmp.ne.s32.totalorder %s2679_s6, %s2012_s10  ;;  %s2386_s29 = int_to_ptr.vmem [resolvable:$true] %s343_s29 }
  0x43   : > { %p2014_p13 = pneg %p2377_p10  ;;  %p2019_p9 = scmp.lt.u32.totalorder %s2012_s10, %s2679_s6 }
  0x45   : > { %p2015_p2 = pnand %p2014_p13, %p2013_p0 }
  0x47   : > { %p2016_p4 = pneg %p2015_p2 }
  0x49   : > { %p2021_p12 = pnand %p2019_p9, %p2016_p4 }
  0x4b   : > { %2024 = shalt.err (!%p2021_p12)
}
  0x4c   : > { %s2025_s17 = scalar_lea.vmem %s2369_s24, 512  ;;  %p2033_p1 = scmp.lt.s32.totalorder %s2369_s24, %s2369_s24 }
  0x4d   : > { %p2026_p3 = scmp.ne.s32.totalorder %s2369_s24, %s2025_s17  ;;  %p2034_p11 = scmp.lt.s32.totalorder %s2025_s17, %s2025_s17 }
  0x4f   : > { %p2028_p7 = pnand %p2026_p3, %p2014_p13  ;;  %p2035_p6 = por %p2034_p11, %p2033_p1 }
  0x51   : > { %p2029_p5 = pneg %p2028_p7 }
  0x53   : > { %p2036_p8 = pnand %p2035_p6, %p2029_p5 }
  0x55   : > { %2039 = shalt.err (!%p2036_p8)
}
  0x56   : > { %s2178_s8 = smov 128   ;;  %s2179_s9 = smov 8  }
  0x57   : > { %1894 = dma.hbm_to_vmem [thread:$0]  (!%p2377_p10), %s2679_s6, 512, %s2369_s24, [#allocation9], %s2178_s8, %s2178_s8, %s2179_s9  }
  0x58   : > { %s333_s27 = scalar_lea.sflag [#allocation3], %s2291_s21  ;;  %s2040_s25 = scalar_lea.hbm %s2384_s15, 128 }
  0x59   : > { %p2041_p6 = scmp.ne.s32.totalorder %s2384_s15, %s2040_s25  ;;  %p2720_p8 = scmp.ne.s32.totalorder %s2711_s18, 0 }
  0x5a   : > { %s2045_s20 = scalar_lea.hbm %s2673_s0, 256  ;;  %p2046_p5 = scmp.lt.u32.totalorder %s2384_s15, %s2673_s0 }
  0x5b   : > { %p2043_p3 = pnand %p2041_p6, %p2720_p8  ;;  %p2047_p7 = scmp.lt.u32.totalorder %s2045_s20, %s2040_s25 }
  0x5c   : > { %p2049_p0 = scmp.lt.u32.totalorder %s2040_s25, %s2384_s15 }
  0x5d   : > { %p2044_p1 = pneg %p2043_p3  ;;  %p2048_p11 = por %p2047_p7, %p2046_p5 }
  0x5f   : > { %p2050_p13 = por %p2049_p0, %p2048_p11 }
  0x61   : > { %p2051_p2 = pnand %p2050_p13, %p2044_p1 }
  0x63   : > { %2054 = shalt.err (!%p2051_p2)
}
  0x64   : > { %s2055_s30 = scalar_lea.vmem %s2386_s29, 128  ;;  %s2180_s24 = smov [#allocation2]  }
  0x65   : > { %p2056_p10 = scmp.ne.s32.totalorder %s2386_s29, %s2055_s30  ;;  %s2060_s10 = sshll.u32 %s2180_s24, 4  ;;  %s2061_s10 = int_to_ptr.vmem [resolvable:$false] %s2060_s10 }
  0x66   : > { %s2062_s26 = scalar_lea.vmem %s2061_s10, 256  ;;  %p2063_p12 = scmp.lt.s32.totalorder %s2386_s29, %s2061_s10 }
  0x67   : > { %p2058_p4 = pnand %p2056_p10, %p2720_p8  ;;  %p2064_p6 = scmp.lt.s32.totalorder %s2062_s26, %s2055_s30 }
  0x69   : > { %p2059_p9 = pneg %p2058_p4  ;;  %p2065_p3 = por %p2064_p6, %p2063_p12 }
  0x6b   : > { %p2066_p5 = pnand %p2065_p3, %p2059_p9 }
  0x6d   : > { %2069 = shalt.err (!%p2066_p5)
}
  0x6e   : > { %p2721_p1 = scmp.ne.s32.totalorder %s2709_s23, 0  ;;  %s1772_s13 = sshll.u32 %s2174_s16, 9 }
  0x6f   : > { %s2438_s2 = scalar_lea.hbm %s2676_s3, %s1772_s13  ;;  %s2722_s20 = sshll.u32 %s2291_s21, 5 }
  0x70   : > { %1898 = dma.hbm_to_vmem [thread:$0]  (!%p2721_p1), %s2384_s15, 128, %s2386_s29, %s333_s27  }
  0x71   : > { %s378_s17 = scalar_lea.vmem [#allocation7], %s2722_s20  ;;  %s2070_s24 = scalar_lea.hbm %s2438_s2, 512 }
  0x72   : > { %s385_s30 = sshll.u32 %s378_s17, 4  ;;  %p2071_p7 = scmp.ne.s32.totalorder %s2438_s2, %s2070_s24  ;;  %s2442_s30 = int_to_ptr.vmem [resolvable:$true] %s385_s30 }
  0x73   : > { %s2075_s27 = scalar_lea.hbm %s2676_s3, 1024  ;;  %p2076_p13 = scmp.lt.u32.totalorder %s2438_s2, %s2676_s3 }
  0x74   : > { %p2073_p11 = pnand %p2071_p7, %p2720_p8  ;;  %p2077_p2 = scmp.lt.u32.totalorder %s2075_s27, %s2070_s24 }
  0x75   : > { %p2079_p4 = scmp.lt.u32.totalorder %s2070_s24, %s2438_s2 }
  0x76   : > { %p2074_p0 = pneg %p2073_p11  ;;  %p2078_p10 = por %p2077_p2, %p2076_p13 }
  0x78   : > { %p2080_p9 = por %p2079_p4, %p2078_p10 }
  0x7a   : > { %p2081_p12 = pnand %p2080_p9, %p2074_p0 }
  0x7c   : > { %2084 = shalt.err (!%p2081_p12)
}
  0x7d   : > { %s2085_s21 = scalar_lea.vmem %s2442_s30, 512  ;;  %s2181_s13 = smov [#allocation7]  }
  0x7e   : > { %p2086_p6 = scmp.ne.s32.totalorder %s2442_s30, %s2085_s21  ;;  %s2090_s25 = sshll.u32 %s2181_s13, 4  ;;  %s2091_s25 = int_to_ptr.vmem [resolvable:$false] %s2090_s25 }
  0x7f   : > { %s2092_s19 = scalar_lea.vmem %s2091_s25, 1024  ;;  %p2093_p7 = scmp.lt.s32.totalorder %s2442_s30, %s2091_s25 }
  0x80   : > { %p2088_p3 = pnand %p2086_p6, %p2720_p8  ;;  %p2094_p11 = scmp.lt.s32.totalorder %s2092_s19, %s2085_s21 }
  0x82   : > { %p2089_p5 = pneg %p2088_p3  ;;  %p2095_p13 = por %p2094_p11, %p2093_p7 }
  0x84   : > { %p2096_p2 = pnand %p2095_p13, %p2089_p5 }
  0x86   : > { %2099 = shalt.err (!%p2096_p2)
}
  0x87   : > { %1904 = dma.hbm_to_vmem [thread:$0]  (!%p2721_p1), %s2438_s2, 512, %s2442_s30, %s2308_s11, %s2178_s8, %s2178_s8, %s2179_s9  }
  0x88   : > { %p2723_p8 = scmp.ne.s32.totalorder %s2718_s22, 0 }
  0x89   : > { %s2472_s18 = sand.u32 (!%p2723_p8), 1, %s2166_s14   ;;  %p2724_p0 = scmp.ne.s32.totalorder (!%p2723_p8), %s2712_s28, 0 }
  0x8a   : > { %397 = sbr.rel (%p2723_p8) target bundleno = 3065 (0xbf9), region = 60  ;;  %s1741_s20 = sshll.u32 (!%p2723_p8), %s2472_s18, 3 }
  0x8b   : > { %s400_s17 = scalar_lea.sflag (!%p2723_p8), [#allocation3], %s2472_s18  ;;  %s403_s23 = scalar_lea.vmem (!%p2723_p8), [#allocation2], %s1741_s20 }
  0x91   : > { %2145 = dma.done.wait (%p2724_p0), %s400_s17, 128  }
  0x92   : > { %2147 = vsyncadd (%p2724_p0), %s400_s17, 4294967168  ;;  %s408_s11 = sand.u32 1, %s2339_s12   ;;  %s411_s8 = scalar_lea.vmem [#allocation5], %s2472_s18 }
  0x93   : > { %s409_s22 = scalar_lea.sflag [#allocation6], %s408_s11 }
  0x94   : > { %2149 = dma.done.wait (%p2724_p0), %s409_s22, 528  }
  0x95   : > { %2151 = vsyncadd (%p2724_p0), %s409_s22, 4294966768  ;;  %s1742_s9 = sshll.u32 %s2472_s18, 5  ;;  %p2725_p1 = scmp.eq.s32.totalorder %s2339_s12, 0 }
  0x96   : > { %s2489_s2 = scalar_lea.vmem [#allocation7], %s1742_s9 }
  0x97   : > { %2153 = dma.done.wait (%p2725_p1), [#allocation9], 512   ;;  %p2726_p10 = pmov %p2725_p1 }
  0x98   : > { %v2182_v0 = vmov 0.0|0.0   ;;  %vm2183_vm0 = vmmov 0   ;;  %v2184_v1 = vmov 0.0   ;;  %v479_v2 = vld [vmem:[%s2677_s4] sm:$0xff]  ;;  %v480_v3 = vld [vmem:[%s2677_s4 + $0x8] sm:$0xff]  ;;  %v481_v4 = vld [vmem:[%s2677_s4 + $0x10] sm:$0xff] }
  0x99   : > { %2155 = vsyncadd (%p2726_p10), [#allocation9], 4294966784  ;;  %1873 = vmatprep.subr.bf16.mxu0 %v2182_v0  ;;  %1810 = vmatprep.mubr.msk.f32.mxu0 %vm2183_vm0, %v2184_v1  ;;  %v1874_v5 = vpack.c.bf16 %v480_v3, %v479_v2  ;;  %v482_v6 = vld [vmem:[%s2677_s4 + $0x18] sm:$0xff]  ;;  %v2512_v8 = vld [vmem:[%s403_s23] sm:$0xff]  ;;  %vm490_vm1 = vcmask 261120   ;;  %s2185_s25 = smov 120  }
  0x9a   : > { %1813 = vmatprep.subr.mxu1 %v2184_v1  ;;  %1815 = vmatprep.mubr.msk.f32.mxu1 %vm2183_vm0, %v2184_v1  ;;  %v1877_v7 = vpack.c.bf16 %v482_v6, %v481_v4  ;;  %v1746_v9 = vld [vmem:[%s2678_s5] ss:$0 sm:$0xff]  ;;  %s2186_s19 = smov 96   ;;  %s2187_s17 = smov 88   ;;  %vm589_vm2 = vcmask 64512   ;;  %v582_v16 = vld [vmem:[%s2489_s2] sm:$0xff] }
  0x9b   : > { %1875 = vmatpush3.bf16.msra.mxu0 %v1874_v5  ;;  %v583_v20 = vld [vmem:[%s2489_s2 + $0x8] sm:$0xff]  ;;  %s2188_s23 = smov 64   ;;  %v2189_v26 = vmov 0   ;;  %p474_p4 = scmp.lt.s32.totalorder %s2339_s12, 1  ;;  %v578_v52 = vld [vmem:[#allocation8] sm:$0xff] }
  0x9c   : > { %1876 = vmatprep.subr.bf16.mxu0 %v2182_v0  ;;  %1963 = vset.pattern.permute.xlu0 %v2189_v26  ;;  %s2190_s24 = smov 56   ;;  %s2191_s15 = smov 80   ;;  %v579_v39 = vld [vmem:[#allocation8 + $0x8] sm:$0xff]  ;;  %v584_v0 = vld [vmem:[%s2489_s2 + $0x10] sm:$0xff] }
  0x9d   : > { %s475_s11 = scalar_select %p474_p4, %s2339_s12, 1  ;;  %v1748_v42 = vld [vmem:[%s411_s8] ss:$0 sm:$0xff] }
  0x9e   : > { %s2192_s29 = smov 112   ;;  %s2193_s8 = smov 48  }
  0x9f   : > { %1878 = vmatpush3.bf16.msra.mxu0 %v1877_v7  ;;  %s1745_s22 = sshll.u32 %s475_s11, 3  ;;  %s2194_s27 = smov 104  }
  0xa0   : > { %1823 = vmatprep.subr.mxu0 %v2184_v1  ;;  %s477_s30 = scalar_lea.vmem %s2674_s1, %s1745_s22  ;;  %s2195_s10 = smov 72  }
  0xa1   : > { %v564_v38 = vld [vmem:[%s477_s30] sm:$0xff]  ;;  %s2196_s26 = smov 40   ;;  %s2727_s13 = sld [smem:[#allocation19_spill]] }
  0xa2   : > { %1811 = vmatmul.mubr.msk.f32.vlgmr.msra.gmra.mrb[0].mxu0 %vm490_vm1, %v2512_v8  ;;  %s2729_s22 = sld [smem:[#allocation23_spill]]  ;;  %s1769_s9 = sshll.u32 %s2339_s12, 7 }
  0xa3   : > { %1825 = vmatprep.mubr.msk.f32.mxu0 %vm2183_vm0, %v2184_v1  ;;  %s473_s28 = scalar_lea.vmem [#allocation10], %s1741_s20  ;;  %s2197_s12 = smov [#allocation10]  }
  0xa4   : > { %s1598_s30 = sshll.u32 %s473_s28, 4  ;;  %s2104_s20 = sshll.u32 %s2197_s12, 4  ;;  %s2630_s30 = int_to_ptr.vmem [resolvable:$true] %s1598_s30  ;;  %s2105_s20 = int_to_ptr.vmem [resolvable:$false] %s2104_s20 }
  0xa5   : > { %p2107_p5 = scmp.lt.s32.totalorder %s2630_s30, %s2105_s20 }
  0xa7   : > { %p2731_p12 = scmp.ne.s32.totalorder %s2727_s13, 0 }
 0x175   : > { %v560_v10 = vpop.f32.mrb[0].mxu0 }
 0x176   : > { %v2522_v11 = vadd.f32 %v1746_v9, %v560_v10  ;;  %v1812_v12 = vpop.f32.mrb[1].mxu0 }
 0x178   : > { %752 = vrot.lane.b32.xlu1 %v2522_v11, %s2185_s25  ;;  %587 = vrot.lane.b32.xlu0 %v2522_v11, %s2186_s19 }
 0x17c   : > { %754 = vrot.lane.b32.xlu0 %v2522_v11, %s2187_s17  ;;  %s2728_s17 = sld [smem:[#allocation22_spill]] }
 0x1ea   : > { %v588_v13 = vpop.permute.xlu0 %587  ;;  %v753_v15 = vpop.permute.xlu1 %752 }
 0x1eb   : > { %1814 = vmatpush3.xpose.msk.msra.mxu1 %vm589_vm2, %v588_v13 }
 0x1ec   : > { %1818 = vmatprep.subr.mxu1 %v2184_v1 }
 0x1ee   : > { %1816 = vmatmul.mubr.msk.f32.vlgmr.msra.gmra.mrb[0].mxu1 %vm589_vm2, %v2522_v11  ;;  %v755_v14 = vpop.permute.xlu0 %754 }
 0x1ef   : > { %1824 = vmatpush3.xpose.msk.msra.mxu0 %vm589_vm2, %v755_v14  ;;  %1820 = vmatprep.mubr.msk.f32.mxu1 %vm2183_vm0, %v2184_v1 }
 0x1f0   : > { %1833 = vmatprep.subr.mxu0 %v2184_v1 }
 0x1f2   : > { %1826 = vmatmul.mubr.msk.f32.vlgmr.msra.gmra.mrb[2].mxu0 %vm589_vm2, %v753_v15 }
 0x1f3   : > { %1835 = vmatprep.mubr.msk.f32.mxu0 %vm2183_vm0, %v2184_v1  ;;  %1834 = vmatpush3.msra.mxu0 %v579_v39 }
 0x1f4   : > { %1843 = vmatprep.subr.mxu0 %v2184_v1 }
 0x2c1   : > { %v660_v17 = vpop.f32.mrb[0].mxu1 }
 0x2c2   : > { %v661_v18 = vadd.f32 %v660_v17, %v582_v16  ;;  %v1817_v19 = vpop.f32.mrb[1].mxu1 }
 0x2c4   : > { %v664_v21 = vsel %vm589_vm2, %v661_v18, -inf }
 0x2c5   : > { %665 = vmax.xlane.f32.xlu1 %v664_v21  ;;  %v826_v22 = vpop.f32.mrb[2].mxu0 }
 0x2c6   : > { %v827_v23 = vadd.f32 %v826_v22, %v583_v20  ;;  %v1827_v24 = vpop.f32.mrb[3].mxu0  ;;  %v580_v20 = vld [vmem:[#allocation8 + $0x10] sm:$0xff] }
 0x2c8   : > { %v830_v25 = vsel %vm589_vm2, %v827_v23, -inf }
 0x2c9   : > { %831 = vmax.xlane.f32.xlu0 %v830_v25 }
 0x2d6   : > { %676 = vrot.lane.b32.xlu1 %v2522_v11, %s2188_s23 }
 0x352   : > { %v666_v27 = vpop.xlane.xlu1 %665 }
 0x353   : > { %v667_v28 = vsub.f32 %v661_v18, %v666_v27 }
 0x355   : > { %v668_v29 = vmul.f32 1.442695, %v667_v28 }
 0x356   : > { %v677_v30 = vpop.permute.xlu1 %676  ;;  %v832_v31 = vpop.xlane.xlu0 %831 }
 0x357   : > { %1964 = vpow2.f32 %v668_v29  ;;  %v833_v32 = vsub.f32 %v827_v23, %v832_v31  ;;  %1819 = vmatpush3.msra.mxu1 %v677_v30  ;;  %v585_v23 = vld [vmem:[%s2489_s2 + $0x18] sm:$0xff] }
 0x358   : > { %1828 = vmatprep.subr.mxu1 %v2184_v1 }
 0x359   : > { %v834_v33 = vmul.f32 1.442695, %v833_v32 }
 0x35b   : > { %1966 = vpow2.f32 %v834_v33 }
 0x361   : > { %v1965_v34 = vpop.eup %1964 }
 0x362   : > { %v670_v35 = vsel %vm589_vm2, %v1965_v34, 0.0 }
 0x363   : > { %671 = vadd.xlane.f32.xlu0 %v670_v35 }
 0x365   : > { %v1967_v36 = vpop.eup %1966 }
 0x366   : > { %v836_v37 = vsel %vm589_vm2, %v1967_v36, 0.0 }
 0x367   : > { %837 = vadd.xlane.f32.xlu1 %v836_v37 }
 0x378   : > { %842 = vrot.lane.b32.xlu1 %v2522_v11, %s2190_s24 }
 0x379   : > { %568 = vperm.xlu0 %1963, %v564_v38  }
 0x37c   : > { %1066 = vrot.lane.b32.xlu1 %v2522_v11, %s2191_s15 }
 0x380   : > { %1064 = vrot.lane.b32.xlu1 %v2522_v11, %s2192_s29  ;;  %s2730_s29 = sld [smem:[#allocation24_spill]] }
 0x3f0   : > { %v672_v40 = vpop.xlane.xlu0 %671 }
 0x3f1   : > { %1968 = vrcp.f32 %v672_v40 }
 0x3f4   : > { %v838_v41 = vpop.xlane.xlu1 %837 }
 0x3f5   : > { %1970 = vrcp.f32 %v838_v41 }
 0x3f8   : > { %v569_v43 = vpop.permute.xlu0 %568  ;;  %v843_v49 = vpop.permute.xlu1 %842 }
 0x3f9   : > { %v2557_v44 = vmul.f32 %v1748_v42, %v569_v43  ;;  %v1765_v43 = vld [vmem:[%s2680_s7] ss:$0 sm:$0xff] }
 0x3fb   : > { %v1969_v45 = vpop.eup %1968 }
 0x3fc   : > { %v674_v46 = vmul.f32 %v1969_v45, %v1965_v34  ;;  %v1067_v55 = vpop.permute.xlu1 %1066 }
 0x3fe   : > { %v675_v47 = vmul.f32 %v674_v46, %v2557_v44 }
 0x3ff   : > { %v1971_v48 = vpop.eup %1970 }
 0x400   : > { %v840_v50 = vmul.f32 %v1971_v48, %v1967_v36  ;;  %1821 = vmatmul.mubr.msk.f32.vlgmr.msra.gmra.mrb[2].mxu1 %vm589_vm2, %v675_v47  ;;  %v1065_v58 = vpop.permute.xlu1 %1064 }
 0x401   : > { %1829 = vmatpush3.msra.mxu1 %v843_v49  ;;  %1830 = vmatprep.mubr.msk.f32.mxu1 %vm2183_vm0, %v2184_v1 }
 0x402   : > { %v841_v51 = vmul.f32 %v840_v50, %v2557_v44  ;;  %1838 = vmatprep.subr.mxu1 %v2184_v1 }
 0x404   : > { %1831 = vmatmul.mubr.msk.f32.vlgmr.msra.gmra.mrb[4].mxu1 %vm589_vm2, %v841_v51 }
 0x405   : > { %1840 = vmatprep.mubr.msk.f32.mxu1 %vm2183_vm0, %v2184_v1  ;;  %1839 = vmatpush3.msra.mxu1 %v578_v52 }
 0x406   : > { %1848 = vmatprep.subr.mxu1 %v2184_v1 }
 0x4d3   : > { %v748_v53 = vpop.f32.mrb[2].mxu1 }
 0x4d4   : > { %v1822_v54 = vpop.f32.mrb[3].mxu1  ;;  %1841 = vmatmul.mubr.msk.f32.vlgmr.msra.gmra.mrb[6].mxu1 %vm589_vm2, %v748_v53 }
 0x4d5   : > { %1850 = vmatprep.mubr.msk.f32.mxu1 %vm2183_vm0, %v2184_v1 }
 0x4d7   : > { %v914_v56 = vpop.f32.mrb[4].mxu1 }
 0x4d8   : > { %v1832_v57 = vpop.f32.mrb[5].mxu1  ;;  %1836 = vmatmul.mubr.msk.f32.vlgmr.msra.gmra.mrb[4].mxu0 %vm589_vm2, %v914_v56 }
 0x4d9   : > { %1844 = vmatpush3.xpose.msk.msra.mxu0 %vm589_vm2, %v1067_v55  ;;  %1845 = vmatprep.mubr.msk.f32.mxu0 %vm2183_vm0, %v2184_v1 }
 0x4da   : > { %1853 = vmatprep.subr.mxu0 %v2184_v1 }
 0x4dc   : > { %1846 = vmatmul.mubr.msk.f32.vlgmr.msra.gmra.mrb[6].mxu0 %vm589_vm2, %v1065_v58 }
 0x4dd   : > { %1855 = vmatprep.mubr.msk.f32.mxu0 %vm2183_vm0, %v2184_v1  ;;  %1854 = vmatpush3.msra.mxu0 %v580_v20 }
 0x4de   : > { %1863 = vmatprep.subr.mxu0 %v2184_v1 }
 0x5a7   : > { %v1060_v59 = vpop.f32.mrb[6].mxu1 }
 0x5a8   : > { %v1842_v60 = vpop.f32.mrb[7].mxu1 }
 0x5ab   : > { %v987_v61 = vpop.f32.mrb[4].mxu0 }
 0x5ac   : > { %v2580_v62 = vadd.f32 %v1060_v59, %v987_v61  ;;  %v1837_v63 = vpop.f32.mrb[5].mxu0  ;;  %v1767_v59 = vld [vmem:[%s2729_s22] ss:$0 sm:$0xff] }
 0x5af   : > { %v1138_v2 = vpop.f32.mrb[6].mxu0 }
 0x5b0   : > { %v1139_v3 = vadd.f32 %v1138_v2, %v584_v0  ;;  %v1847_v4 = vpop.f32.mrb[7].mxu0 }
 0x5b2   : > { %v1142_v5 = vsel %vm589_vm2, %v1139_v3, -inf }
 0x5b3   : > { %1143 = vmax.xlane.f32.xlu1 %v1142_v5 }
 0x5c4   : > { %1154 = vrot.lane.b32.xlu1 %v2522_v11, %s2193_s8  ;;  %s2628_s8 = scalar_lea.hbm %s2730_s29, %s1769_s9 }
 0x5c8   : > { %1304 = vrot.lane.b32.xlu1 %v2522_v11, %s2194_s27  ;;  %s1585_s27 = scalar_lea.sflag [#allocation4], %s2472_s18 }
 0x640   : > { %v1144_v6 = vpop.xlane.xlu1 %1143 }
 0x641   : > { %v1145_v7 = vsub.f32 %v1139_v3, %v1144_v6 }
 0x643   : > { %v1146_v9 = vmul.f32 1.442695, %v1145_v7 }
 0x644   : > { %v1155_v10 = vpop.permute.xlu1 %1154 }
 0x645   : > { %1972 = vpow2.f32 %v1146_v9  ;;  %1849 = vmatpush3.msra.mxu1 %v1155_v10 }
 0x646   : > { %1858 = vmatprep.subr.mxu1 %v2184_v1 }
 0x648   : > { %v1305_v19 = vpop.permute.xlu1 %1304 }
 0x64f   : > { %v1973_v12 = vpop.eup %1972 }
 0x650   : > { %v1148_v13 = vsel %vm589_vm2, %v1973_v12, 0.0 }
 0x651   : > { %1149 = vadd.xlane.f32.xlu0 %v1148_v13 }
 0x667   : > { %1306 = vrot.lane.b32.xlu0 %v2522_v11, %s2195_s10  ;;  %s2100_s10 = scalar_lea.vmem %s2630_s30, 128 }
 0x668   : > { %p2101_p9 = scmp.ne.s32.totalorder %s2630_s30, %s2100_s10 }
 0x66a   : > { %p2102_p6 = pnand %p2101_p9, %p2731_p12 }
 0x66c   : > { %p2103_p3 = pneg %p2102_p6 }
 0x6de   : > { %v1150_v14 = vpop.xlane.xlu0 %1149 }
 0x6df   : > { %1974 = vrcp.f32 %v1150_v14 }
 0x6e2   : > { %v1307_v18 = vpop.permute.xlu0 %1306 }
 0x6e9   : > { %v1975_v15 = vpop.eup %1974 }
 0x6ea   : > { %v1152_v16 = vmul.f32 %v1975_v15, %v1973_v12 }
 0x6ec   : > { %v1153_v17 = vmul.f32 %v1152_v16, %v2557_v44 }
 0x6ee   : > { %1851 = vmatmul.mubr.msk.f32.vlgmr.msra.gmra.mrb[8].mxu1 %vm589_vm2, %v1153_v17 }
 0x6ef   : > { %1859 = vmatpush3.xpose.msk.msra.mxu1 %vm589_vm2, %v1307_v18  ;;  %1860 = vmatprep.mubr.msk.f32.mxu1 %vm2183_vm0, %v2184_v1 }
 0x6f0   : > { %1868 = vmatprep.subr.mxu1 %v2184_v1 }
 0x6f2   : > { %1861 = vmatmul.mubr.msk.f32.vlgmr.msra.gmra.mrb[10].mxu1 %vm589_vm2, %v1305_v19 }
 0x6f3   : > { %1870 = vmatprep.mubr.msk.f32.mxu1 %vm2183_vm0, %v2184_v1 }
 0x7c1   : > { %v1226_v21 = vpop.f32.mrb[8].mxu1 }
 0x7c2   : > { %v1852_v22 = vpop.f32.mrb[9].mxu1  ;;  %1856 = vmatmul.mubr.msk.f32.vlgmr.msra.gmra.mrb[8].mxu0 %vm589_vm2, %v1226_v21 }
 0x7c3   : > { %1865 = vmatprep.mubr.msk.f32.mxu0 %vm2183_vm0, %v2184_v1  ;;  %v581_v1 = vld [vmem:[#allocation8 + $0x18] sm:$0xff] }
 0x7c4   : > { %1869 = vmatpush3.msra.mxu1 %v581_v1 }
 0x7c5   : > { %v1378_v24 = vpop.f32.mrb[10].mxu1 }
 0x7c6   : > { %v1379_v25 = vadd.f32 %v1378_v24, %v585_v23  ;;  %v1862_v26 = vpop.f32.mrb[11].mxu1 }
 0x7c8   : > { %v1382_v27 = vsel %vm589_vm2, %v1379_v25, -inf }
 0x7c9   : > { %1383 = vmax.xlane.f32.xlu1 %v1382_v27 }
 0x7da   : > { %1394 = vrot.lane.b32.xlu1 %v2522_v11, %s2196_s26  ;;  %s2106_s26 = scalar_lea.vmem %s2105_s20, 256 }
 0x7db   : > { %p2108_p7 = scmp.lt.s32.totalorder %s2106_s26, %s2100_s10 }
 0x7dd   : > { %p2109_p11 = por %p2108_p7, %p2107_p5 }
 0x7df   : > { %p2110_p13 = pnand %p2109_p11, %p2103_p3 }
 0x856   : > { %v1384_v28 = vpop.xlane.xlu1 %1383 }
 0x857   : > { %v1385_v29 = vsub.f32 %v1379_v25, %v1384_v28 }
 0x859   : > { %v1386_v30 = vmul.f32 1.442695, %v1385_v29 }
 0x85a   : > { %v1395_v31 = vpop.permute.xlu1 %1394 }
 0x85b   : > { %1976 = vpow2.f32 %v1386_v30  ;;  %1864 = vmatpush3.msra.mxu0 %v1395_v31 }
 0x865   : > { %v1977_v32 = vpop.eup %1976 }
 0x866   : > { %v1388_v33 = vsel %vm589_vm2, %v1977_v32, 0.0 }
 0x867   : > { %1389 = vadd.xlane.f32.xlu0 %v1388_v33 }
 0x895   : > { %v1299_v34 = vpop.f32.mrb[8].mxu0 }
 0x896   : > { %v1303_v35 = vadd.f32 %v1299_v34, %v2580_v62  ;;  %v1857_v36 = vpop.f32.mrb[9].mxu0 }
 0x8f4   : > { %v1390_v37 = vpop.xlane.xlu0 %1389 }
 0x8f5   : > { %1978 = vrcp.f32 %v1390_v37 }
 0x8ff   : > { %v1979_v38 = vpop.eup %1978 }
 0x900   : > { %v1392_v11 = vmul.f32 %v1979_v38, %v1977_v32 }
 0x902   : > { %v1393_v39 = vmul.f32 %v1392_v11, %v2557_v44 }
 0x904   : > { %1866 = vmatmul.mubr.msk.f32.vlgmr.msra.gmra.mrb[10].mxu0 %vm589_vm2, %v1393_v39 }
 0x9d7   : > { %v1466_v40 = vpop.f32.mrb[10].mxu0 }
 0x9d8   : > { %v1867_v41 = vpop.f32.mrb[11].mxu0  ;;  %1871 = vmatmul.mubr.msk.f32.vlgmr.msra.gmra.mrb[12].mxu1 %vm589_vm2, %v1466_v40 }
 0xaab   : > { %v1539_v42 = vpop.f32.mrb[12].mxu1 }
 0xaac   : > { %v1543_v45 = vadd.f32 %v1539_v42, %v1303_v35  ;;  %v1872_v46 = vpop.f32.mrb[13].mxu1 }
 0xaae   : > { %v1551_v47 = vadd.f32 %v1765_v43, %v1543_v45 }
 0xab0   : > { %v1552_v48 = vadd.f32 %v1551_v47, %v2512_v8  ;;  %v1766_v8 = vld [vmem:[%s2728_s17] ss:$0 sm:$0xff] }
 0xab2   : > { %v1553_v49 = vsel %vm490_vm1, %v1552_v48, 0.0 }
 0xab3   : > { %1554 = vadd.xlane.f32.xlu0 %v1553_v49 }
 0xb40   : > { %v1555_v44 = vpop.xlane.xlu0 %1554 }
 0xb41   : > { %v1557_v50 = vmul.f32 0.03125, %v1555_v44 }
 0xb43   : > { %v1558_v51 = vsub.f32 %v1552_v48, %v1557_v50 }
 0xb45   : > { %v1559_v52 = vmul.f32 %v1558_v51, %v1558_v51 }
 0xb47   : > { %v1560_v53 = vsel %vm490_vm1, %v1559_v52, 0.0 }
 0xb48   : > { %1561 = vadd.xlane.f32.xlu0 %v1560_v53 }
 0xbd5   : > { %v1562_v54 = vpop.xlane.xlu0 %1561 }
 0xbd6   : > { %v1563_v55 = vmul.f32 0.03125, %v1562_v54 }
 0xbd8   : > { %v1564_v56 = vadd.f32 1e-05, %v1563_v55 }
 0xbda   : > { %1980 = vrsqrt.f32 %v1564_v56 }
 0xbe4   : > { %v1981_v57 = vpop.eup %1980 }
 0xbe5   : > { %v1566_v58 = vmul.f32 %v1981_v57, %v1558_v51 }
 0xbe7   : > { %v1574_v60 = vmul.f32 %v1766_v8, %v1566_v58 }
 0xbe9   : > { %v1582_v61 = vadd.f32 %v1767_v59, %v1574_v60 }
 0xbeb   : > { %1583 = vst.msk [vmem:[%s473_s28] sm:$0xff] %vm490_vm1, %v1582_v61 }
 0xbec   : > { %2113 = shalt.err (!%p2110_p13)
}
 0xbed   : > { %s2114_s18 = scalar_lea.hbm %s2628_s8, 128  ;;  %s2118_s25 = scalar_lea.hbm %s2730_s29, 256 }
 0xbee   : > { %p2115_p2 = scmp.ne.s32.totalorder %s2628_s8, %s2114_s18  ;;  %p2119_p1 = scmp.lt.u32.totalorder %s2628_s8, %s2730_s29 }
 0xbef   : > { %p2120_p10 = scmp.lt.u32.totalorder %s2118_s25, %s2114_s18  ;;  %p2122_p9 = scmp.lt.u32.totalorder %s2114_s18, %s2628_s8 }
 0xbf0   : > { %p2116_p8 = pnand %p2115_p2, %p2731_p12 }
 0xbf1   : > { %p2121_p4 = por %p2120_p10, %p2119_p1 }
 0xbf2   : > { %p2117_p0 = pneg %p2116_p8 }
 0xbf3   : > { %p2123_p6 = por %p2122_p9, %p2121_p4 }
 0xbf5   : > { %p2124_p3 = pnand %p2123_p6, %p2117_p0 }
 0xbf7   : > { %2127 = shalt.err (!%p2124_p3)
}
 0xbf8   : > { %1889 = dma.vmem_to_hbm [thread:$0]  (%p2731_p12), %s2630_s30, 128, %s2628_s8, %s1585_s27  }
 0xbf9 PF: > { %s2732_s23 = sld [smem:[#allocation15_spill]]  ;;  %s2733_s11 = sld [smem:[#allocation20_spill]] }
 0xbfa   : > { %p2735_p7 = scmp.ge.s32.totalorder %s2174_s16, 2 }
 0xbff   : > { %s1610_s22 = sand.u32 1, %s2732_s23   ;;  %p2734_p5 = scmp.ne.s32.totalorder %s2733_s11, 0 }
 0xc00   : > { %s1611_s9 = scalar_lea.sflag [#allocation4], %s1610_s22 }
 0xc01   : > { %p1906_p11 = pnand %p2735_p7, %p2734_p5 }
 0xc03   : > { %2157 = dma.done.wait (!%p1906_p11), %s1611_s9, 128  }
 0xc04   : > { %2159 = vsyncadd (!%p1906_p11), %s1611_s9, 4294967168  ;;  %s2736_s16 = sld [smem:[#allocation17_spill]]  ;;  %s2737_s28 = sld [smem:[#allocation16_spill]] }
 0xc05   : > { %s2738_s15 = sld [smem:[#allocation18_spill]]  ;;  %s2739_s13 = smov %s2166_s14 }
 0xc0a   : > { %p27_p13 = scmp.ge.s32.totalorder %s2736_s16, 4   ;;  %s2740_s14 = smov %s2737_s28 }
 0xc0c   :  { %29 = sbr.rel (!%p27_p13) target bundleno = 13 (0xd), region = 136 }
 0xc13   :  { %1616 = vsyncpa [#allocation3], 1 }
 0xc14   :  { %1618 = vsyncpa [#allocation3 + $0x1], 1 }
 0xc15   :  { %1619 = vsyncpa [#allocation6], 1 }
 0xc16   :  { %1621 = vsyncpa [#allocation6 + $0x1], 1 }
 0xc17   :  { %1622 = vsyncpa [#allocation9], 1 }
 0xc18   :  { %1623 = vsyncpa [#allocation4], 1 }
 0xc19   :  { %1625 = vsyncpa [#allocation4 + $0x1], 1 }

</bundles_post_ra>
